<compile_context>
chip_gen: v7x
topology: tpu7x:2x2x1
jax: 0.10.0
libtpu: 0.0.40
codegen_flags: <defaults>
</compile_context>

<pallas_src>
import jax
import jax.numpy as jnp
from jax.experimental import pallas as pl
from jax.experimental.pallas import tpu as pltpu


def iris_mlp_kernel(xT_ref, w1T_ref, b1_ref, w2T_ref, b2_ref, o_ref):
    # fc1: (10,4) @ (4,TB) + (10,1) -> ReLU   (f32 MXU accumulation)
    h = jnp.dot(w1T_ref[...], xT_ref[...], preferred_element_type=jnp.float32)
    h = jnp.maximum(h + b1_ref[...], 0.0)
    # fc2: (3,10) @ (10,TB) + (3,1)
    y = jnp.dot(w2T_ref[...], h, preferred_element_type=jnp.float32)
    o_ref[...] = (y + b2_ref[...]).astype(o_ref.dtype)


def _round_up(v, m):
    return ((v + m - 1) // m) * m


def _choose_tb(batch, max_tb=32768):
    """Pick the batch (lane) tile: multiple of 128, as big as comfortably fits
    VMEM, but small enough to give >=2 grid steps when the batch allows it so
    the 'parallel' axis can be sharded across v7x's two TensorCores."""
    b128 = max(128, _round_up(batch, 128))
    tb = min(max_tb, b128)
    if b128 >= 256:  # guarantee at least 2 grid steps
        tb = min(tb, max(128, _round_up((b128 + 1) // 2, 128)))
    return tb


def iris_net_forward_fm(xT, w1, b1, w2, b2, *, max_tb=32768):
    """Preferred feature-major forward: xT (4, B) f32 -> (3, B) f32.

    No wrapper-side transpose/pad copies; ragged edge blocks are handled by
    Pallas (stores past column B are masked).
    """
    f_in, B = xT.shape
    assert f_in == 4, "IrisNet expects 4 input features"
    tb = _choose_tb(B, max_tb)
    grid = (pl.cdiv(B, tb),)

    w1T = w1.T.astype(jnp.float32)              # (10, 4)
    w2T = w2.T.astype(jnp.float32)              # (3, 10)
    b1c = b1.reshape(10, 1).astype(jnp.float32)  # broadcast over lanes
    b2c = b2.reshape(3, 1).astype(jnp.float32)

    param_bytes = (w1T.size + b1c.size + w2T.size + b2c.size) * 4
    cost = pl.CostEstimate(
        flops=2 * B * (4 * 10 + 10 * 3),
        transcendentals=0,
        bytes_accessed=B * (4 + 3) * 4 + param_bytes,
    )

    return pl.pallas_call(
        iris_mlp_kernel,
        out_shape=jax.ShapeDtypeStruct((3, B), jnp.float32),
        grid_spec=pltpu.PrefetchScalarGridSpec(
            num_scalar_prefetch=0,
            grid=grid,
            in_specs=[
                pl.BlockSpec((4, tb), lambda i: (0, i)),   # xT tile (streamed)
                pl.BlockSpec((10, 4), lambda i: (0, 0)),   # W1^T  (VMEM-resident)
                pl.BlockSpec((10, 1), lambda i: (0, 0)),   # b1    (VMEM-resident)
                pl.BlockSpec((3, 10), lambda i: (0, 0)),   # W2^T  (VMEM-resident)
                pl.BlockSpec((3, 1), lambda i: (0, 0)),    # b2    (VMEM-resident)
            ],
            out_specs=pl.BlockSpec((3, tb), lambda i: (0, i)),
        ),
        compiler_params=pltpu.CompilerParams(
            dimension_semantics=("parallel",),
        ),
        cost_estimate=cost,
    )(xT.astype(jnp.float32), w1T, b1c, w2T, b2c)


def iris_net_forward(x, w1, b1, w2, b2, *, max_tb=32768):
    """Batch-major interface matching the PyTorch module: x (B, 4) -> (B, 3)."""
    yT = iris_net_forward_fm(x.T, w1, b1, w2, b2, max_tb=max_tb)
    return yT.T


def init_params(key):
    """Deterministic init mimicking PyTorch nn.Linear default U[-1/sqrt(fan_in), +]."""
    k1, k2, k3, k4 = jax.random.split(key, 4)
    bound1 = 1.0 / jnp.sqrt(4.0)
    bound2 = 1.0 / jnp.sqrt(10.0)
    # stored as (in, out): transpose of PyTorch's (out, in)
    w1 = jax.random.uniform(k1, (4, 10), jnp.float32, -bound1, bound1)
    b1 = jax.random.uniform(k2, (1, 10), jnp.float32, -bound1, bound1)
    w2 = jax.random.uniform(k3, (10, 3), jnp.float32, -bound2, bound2)
    b2 = jax.random.uniform(k4, (1, 3), jnp.float32, -bound2, bound2)
    return w1, b1, w2, b2


def _reference(x, w1, b1, w2, b2):
    return jnp.maximum(x @ w1 + b1, 0.0) @ w2 + b2


if __name__ == "__main__":
    key = jax.random.PRNGKey(0)
    kx, kx2, kx3, kp = jax.random.split(key, 4)
    w1, b1, w2, b2 = init_params(kp)

    # Small demo batch (iris features = 4), batch-major PyTorch-style interface.
    B = 8
    x = jax.random.normal(kx, (B, 4), dtype=jnp.float32)
    out = jax.block_until_ready(iris_net_forward(x, w1, b1, w2, b2))
    ref = _reference(x, w1, b1, w2, b2)
    assert out.shape == (B, 3)
    assert jnp.allclose(out, ref, atol=1e-5, rtol=1e-5)

    # Non-multiple-of-128 batch: exercises the ragged edge block (no explicit
    # pad) and the >=2-step parallel grid.
    B2 = 1000
    x2 = jax.random.normal(kx2, (B2, 4), dtype=jnp.float32)
    out2 = jax.block_until_ready(iris_net_forward(x2, w1, b1, w2, b2))
    ref2 = _reference(x2, w1, b1, w2, b2)
    assert out2.shape == (B2, 3)
    assert jnp.allclose(out2, ref2, atol=1e-5, rtol=1e-5)

    # Preferred feature-major path: zero wrapper-side transpose/pad copies.
    B3 = 4096
    xT3 = jax.random.normal(kx3, (4, B3), dtype=jnp.float32)
    out3 = jax.block_until_ready(iris_net_forward_fm(xT3, w1, b1, w2, b2))
    ref3 = _reference(xT3.T, w1, b1, w2, b2).T
    assert out3.shape == (3, B3)
    assert jnp.allclose(out3, ref3, atol=1e-5, rtol=1e-5)

    print("KERNEL_OK")
</pallas_src>

<mosaic_0001>
module attributes {stable_mosaic.version = 11 : i64} {
  func.func @iris_mlp_kernel(%arg0: i32, %arg1: memref<4x128xf32, #tpu.memory_space<vmem>>, %arg2: memref<10x4xf32, #tpu.memory_space<vmem>>, %arg3: memref<10x1xf32, #tpu.memory_space<vmem>>, %arg4: memref<3x10xf32, #tpu.memory_space<vmem>>, %arg5: memref<3x1xf32, #tpu.memory_space<vmem>>, %arg6: memref<3x128xf32, #tpu.memory_space<vmem>>) attributes {dimension_semantics = [#tpu.dimension_semantics<parallel>], iteration_bounds = array<i64: 1>, scalar_prefetch = 0 : i64, scratch_operands = 0 : i64, tpu.core_type = #tpu.core_type<tc>, window_params = [{transform_indices = @transform_0, window_bounds = array<i64: 4, 128>}, {pipeline_mode = #tpu.pipeline_mode<synchronous>, transform_indices = @transform_1, window_bounds = array<i64: 10, 4>}, {pipeline_mode = #tpu.pipeline_mode<synchronous>, transform_indices = @transform_2, window_bounds = array<i64: 10, 1>}, {pipeline_mode = #tpu.pipeline_mode<synchronous>, transform_indices = @transform_3, window_bounds = array<i64: 3, 10>}, {pipeline_mode = #tpu.pipeline_mode<synchronous>, transform_indices = @transform_4, window_bounds = array<i64: 3, 1>}, {transform_indices = @transform_5, window_bounds = array<i64: 3, 128>}]} {
    %c0 = arith.constant 0 : index
    %c0_0 = arith.constant 0 : index
    %0 = vector.load %arg2[%c0, %c0_0] : memref<10x4xf32, #tpu.memory_space<vmem>>, vector<10x4xf32>
    %c0_1 = arith.constant 0 : index
    %c0_2 = arith.constant 0 : index
    %1 = vector.load %arg1[%c0_1, %c0_2] : memref<4x128xf32, #tpu.memory_space<vmem>>, vector<4x128xf32>
    %cst = arith.constant dense<0.000000e+00> : vector<10x128xf32>
    %2 = tpu.matmul %0, %1, %cst {dimension_numbers = #tpu.dot_dimension_numbers<[1], [0], [0], [1], [0, 0, 1, 1], [], []>} : vector<10x4xf32>, vector<4x128xf32>, vector<10x128xf32> -> vector<10x128xf32>
    %c0_3 = arith.constant 0 : index
    %c0_4 = arith.constant 0 : index
    %3 = vector.load %arg3[%c0_3, %c0_4] : memref<10x1xf32, #tpu.memory_space<vmem>>, vector<10x1xf32>
    %4 = vector.broadcast %3 : vector<10x1xf32> to vector<10x128xf32>
    %5 = arith.addf %2, %4 : vector<10x128xf32>
    %cst_5 = arith.constant 0.000000e+00 : f32
    %6 = vector.broadcast %cst_5 : f32 to vector<10x128xf32>
    %7 = arith.maximumf %5, %6 : vector<10x128xf32>
    %c0_6 = arith.constant 0 : index
    %c0_7 = arith.constant 0 : index
    %8 = vector.load %arg4[%c0_6, %c0_7] : memref<3x10xf32, #tpu.memory_space<vmem>>, vector<3x10xf32>
    %cst_8 = arith.constant dense<0.000000e+00> : vector<3x128xf32>
    %9 = tpu.matmul %8, %7, %cst_8 {dimension_numbers = #tpu.dot_dimension_numbers<[1], [0], [0], [1], [0, 0, 1, 1], [], []>} : vector<3x10xf32>, vector<10x128xf32>, vector<3x128xf32> -> vector<3x128xf32>
    %c0_9 = arith.constant 0 : index
    %c0_10 = arith.constant 0 : index
    %10 = vector.load %arg5[%c0_9, %c0_10] : memref<3x1xf32, #tpu.memory_space<vmem>>, vector<3x1xf32>
    %11 = vector.broadcast %10 : vector<3x1xf32> to vector<3x128xf32>
    %12 = arith.addf %9, %11 : vector<3x128xf32>
    %c0_11 = arith.constant 0 : index
    %c0_12 = arith.constant 0 : index
    %13 = vector.load %arg6[%c0_11, %c0_12] : memref<3x128xf32, #tpu.memory_space<vmem>>, vector<3x128xf32>
    tpu.vector_store %arg6[%c0_11, %c0_12], %12 {strides = array<i32>} : memref<3x128xf32, #tpu.memory_space<vmem>>, vector<3x128xf32>,
    return
  }
  func.func @transform_0(%arg0: i32) -> (i32, i32) {
    %c0_i32 = arith.constant 0 : i32
    %c0_i32_0 = arith.constant 0 : i32
    return %c0_i32, %arg0 : i32, i32
  }
  func.func @transform_1(%arg0: i32) -> (i32, i32) {
    %c0_i32 = arith.constant 0 : i32
    %c0_i32_0 = arith.constant 0 : i32
    %c0_i32_1 = arith.constant 0 : i32
    return %c0_i32, %c0_i32_0 : i32, i32
  }
  func.func @transform_2(%arg0: i32) -> (i32, i32) {
    %c0_i32 = arith.constant 0 : i32
    %c0_i32_0 = arith.constant 0 : i32
    %c0_i32_1 = arith.constant 0 : i32
    return %c0_i32, %c0_i32_0 : i32, i32
  }
  func.func @transform_3(%arg0: i32) -> (i32, i32) {
    %c0_i32 = arith.constant 0 : i32
    %c0_i32_0 = arith.constant 0 : i32
    %c0_i32_1 = arith.constant 0 : i32
    return %c0_i32, %c0_i32_0 : i32, i32
  }
  func.func @transform_4(%arg0: i32) -> (i32, i32) {
    %c0_i32 = arith.constant 0 : i32
    %c0_i32_0 = arith.constant 0 : i32
    %c0_i32_1 = arith.constant 0 : i32
    return %c0_i32, %c0_i32_0 : i32, i32
  }
  func.func @transform_5(%arg0: i32) -> (i32, i32) {
    %c0_i32 = arith.constant 0 : i32
    %c0_i32_0 = arith.constant 0 : i32
    return %c0_i32, %arg0 : i32, i32
  }
}

</mosaic_0001>

<bundles_post_ra>
// kernel: tpu_custom_call.1
= control target key start
LH: loop header
LB: loop body
LE: loop exit
PB: predicated region body
PF: predicated region fallthrough
CT: control target
= control target key end

     0   :  { %vm43_vm0 = vcmask 1043456   ;;  %vm36_vm1 = vcmask 31744   ;;  %v283_v4 = vmov 0   ;;  %s352_s0 = inlined_call_operand.vmem [shape: f32[4,8], index: 0, kind: input, shape index: {}]   ;;  %s353_s1 = inlined_call_operand.vmem [shape: f32[10,4], index: 1, kind: input, shape index: {}]   ;;  %s354_s2 = inlined_call_operand.vmem [shape: f32[10,1], index: 2, kind: input, shape index: {}]   ;;  %s355_s3 = inlined_call_operand.vmem [shape: f32[3,10], index: 3, kind: input, shape index: {}]   ;;  %s356_s4 = inlined_call_operand.vmem [shape: f32[3,1], index: 4, kind: input, shape index: {}]   ;;  %s357_s5 = inlined_call_operand.hbm [shape: f32[3,8], index: 5, kind: output, shape index: {}]  }
   0x1   :  { %v23_v0 = vld [vmem:[%s352_s0] sm:$0xf]  ;;  %v22_v2 = vld [vmem:[%s353_s1 + $0x8] sm:$0x3]  ;;  %257 = vset.pattern.permute.xlu0 %v283_v4 }
   0x2   :  { %v21_v1 = vld [vmem:[%s353_s1] sm:$0xff]  ;;  %235 = vmatprep.subr.msk.mxu0 %vm43_vm0, %v23_v0 }
   0x3   :  { %237 = vmatprep.mubr.msk.f32.mxu0 %vm36_vm1, %v21_v1  ;;  %v24_v3 = vld [vmem:[%s354_s2] sm:$0xff]  ;;  %236 = vmatpush3.msk.msra.mxu0 %vm43_vm0, %v23_v0 }
   0x4   :  { %10 = vsyncpa [#allocation3], 0  ;;  %238 = vmatmul.mubr.msk.f32.vlgmr.msra.gmra.mrb[0].mxu0 %vm36_vm1, %v22_v2  ;;  %28 = vperm.xlu0 %257, %v24_v3   ;;  %v25_v5 = vld [vmem:[%s354_s2 + $0x8] sm:$0x3]  ;;  %v284_v6 = vmov 0.0|0.0   ;;  %vm285_vm2 = vmmov 0  }
   0x5   :  { %258 = vset.pattern.permute.xlu1 %v283_v4  ;;  %247 = vmatprep.subr.bf16.mxu1 %v284_v6  ;;  %v286_v7 = vmov 0.0   ;;  %v125_v8 = vld [vmem:[%s356_s4] sm:$0x7]  ;;  %vm135_vm3 = vcmask 1041408   ;;  %vm287_vm4 = vmmov 1   ;;  %vm131_vm6 = vcmask 80896  }
   0x6   :  { %244 = vmatprep.mubr.msk.f32.mxu1 %vm285_vm2, %v286_v7  ;;  %128 = vperm.xlu1 %258, %v125_v8   ;;  %vm249_vm5 = vmpackc.low %vm135_vm3, %vm287_vm4  ;;  %v124_v18 = vld [vmem:[%s355_s3] sm:$0x7]  ;;  %s288_s4 = smov [#allocation2]  }
   0x7   :  { %s216_s29 = sshll.u32 %s288_s4, 4  ;;  %s217_s29 = int_to_ptr.vmem [resolvable:$true] %s216_s29 }
   0x8   :  { %33 = vperm.xlu0 %257, %v25_v5   ;;  %s259_s30 = scalar_lea.vmem %s217_s29, 64  ;;  %p264_p1 = scmp.lt.s32.totalorder %s217_s29, %s217_s29 }
   0x9   :  { %p260_p0 = scmp.ne.s32.totalorder %s217_s29, %s259_s30  ;;  %p265_p2 = scmp.lt.s32.totalorder %s259_s30, %s259_s30 }
   0xb   :  { %p266_p3 = por %p265_p2, %p264_p1 }
   0xd   :  { %p267_p4 = pnand %p266_p3, %p260_p0 }
  0x83   :  { %v29_v9 = vpop.permute.xlu0 %28 }
  0x85   :  { %v129_v19 = vpop.permute.xlu1 %128 }
  0x87   :  { %v34_v10 = vpop.permute.xlu0 %33 }
  0xd7   :  { %v239_v11 = vpop.f32.mrb[0].mxu0 }
  0xd8   :  { %v119_v12 = vadd.f32 %v239_v11, %v34_v10  ;;  %v113_v13 = vpop.f32.mrb[1].mxu0 }
  0xd9   :  { %v114_v14 = vadd.f32 %v113_v13, %v29_v9 }
  0xda   :  { %v123_v15 = vmax.f32 %v119_v12, 0.0 }
  0xdb   :  { %v122_v16 = vmax.f32 %v114_v14, 0.0 }
  0xdd   :  { %v248_v17 = vpack.c.bf16 %v123_v15, %v122_v16 }
  0xdf   :  { %250 = vmatpush3.bf16.msk.msra.mxu1 %vm249_vm5, %v248_v17 }
  0xe2   :  { %245 = vmatmul.mubr.msk.f32.vlgmr.msra.gmra.mrb[0].mxu1 %vm131_vm6, %v124_v18 }
 0x1b5   :  { %v205_v20 = vpop.f32.mrb[0].mxu1 }
 0x1b6   :  { %v206_v21 = vadd.f32 %v205_v20, %v129_v19  ;;  %v246_v22 = vpop.f32.mrb[1].mxu1 }
 0x1b8   :  { %209 = vst [vmem:[#allocation2] sm:$0x7] %v206_v21 }
 0x1b9   :  { %270 = shalt.err (!%p267_p4)
}
 0x1ba   :  { %s271_s3 = scalar_lea.hbm %s357_s5, 64 }
 0x1bb   :  { %p272_p5 = scmp.ne.s32.totalorder %s357_s5, %s271_s3  ;;  %p275_p6 = scmp.lt.u32.totalorder %s271_s3, %s357_s5 }
 0x1bd   :  { %p277_p7 = pnand %p275_p6, %p272_p5 }
 0x1bf   :  { %280 = shalt.err (!%p277_p7)
}
 0x1c0   :  { %219 = dma.vmem_to_hbm [thread:$0]  %s217_s29, 64, %s357_s5, [#allocation3]  }
 0x1c1   :  { %281 = dma.done.wait [#allocation3], 64  }
 0x1c2   :  { %282 = vsyncadd [#allocation3], 4294967232 }
 0x1c3   :  { %223 = vsyncpa [#allocation3], 1 }

</bundles_post_ra>
